<compile_context>
chip_gen: v6e
topology: v6e:2x2x1
jax: 0.10.0
libtpu: 0.0.40
codegen_flags: <defaults>
</compile_context>

<pallas_src>
import jax
import jax.numpy as jnp
from jax.experimental import pallas as pl
from jax.experimental.pallas import tpu as pltpu


def _round_up(x, m):
    return ((x + m - 1) // m) * m


def _cdiv(a, b):
    return (a + b - 1) // b


# --------------------------------------------------------------------------
# Kernels
# --------------------------------------------------------------------------
def _fused_kernel_reduce(x_ref, w1_ref, c_ref, o_ref):
    # x_ref : (tb, inp_dim)  f32   (cast to bf16 in-kernel)
    # w1_ref: (inp_dim, hpad) bf16 (pre-transposed dense weight, zero-padded)
    # c_ref : (1, hpad)       f32  (d1 * w2[0] * scaling, zero-padded)
    # o_ref : (tb, 1)         f32
    x = x_ref[...].astype(jnp.bfloat16)                       # VPU cast, tiny tile
    h = jnp.dot(x, w1_ref[...], preferred_element_type=jnp.float32)  # MXU
    h = jnp.maximum(h, 0.0)                                   # ReLU (VPU)
    # VPU multiply + XLU lane reduce replaces an N=1 MXU matmul.
    o_ref[...] = jnp.sum(h * c_ref[...], axis=-1, keepdims=True)


def _fused_kernel_matmul(x_ref, w1_ref, w2_ref, o_ref):
    # General outp_dim > 1 path; w2_ref already has d1 and scaling folded in.
    x = x_ref[...].astype(jnp.bfloat16)
    h = jnp.dot(x, w1_ref[...], preferred_element_type=jnp.float32)
    h = jnp.maximum(h, 0.0)
    o_ref[...] = jnp.dot(h.astype(jnp.bfloat16), w2_ref[...],
                         preferred_element_type=jnp.float32)


# --------------------------------------------------------------------------
# Tiling / VMEM helpers
# --------------------------------------------------------------------------
def _vmem_capacity_bytes():
    try:
        return int(pltpu.get_tpu_info().vmem_capacity_bytes)
    except Exception:
        return 64 * 2**20        # conservative: v7x per-TensorCore VMEM


def _batch_tile_cap(inp_dim, hpad, outp_dim, weight_bytes, vmem_cap):
    # Leave half of VMEM for compiler temporaries; count weights twice in case
    # the single-buffer request is not honored (fallback path).
    budget = max(vmem_cap // 2 - 2 * weight_bytes, 1 << 20)
    # double-buffered x / out tiles + f32 hidden tile (x2 headroom for relu copy)
    per_row = 2 * inp_dim * 4 + 2 * outp_dim * 4 + 2 * hpad * 4
    cap = (budget // per_row) // 8 * 8
    return int(max(8, min(2048, cap)))


def _choose_tiles(n, tb_cap):
    # Aim for >= 2 grid steps (so v7x's two TensorCores both get work) while
    # keeping the batch tile a multiple of 8 and within the VMEM-derived cap.
    tb = min(tb_cap, max(8, _round_up(_cdiv(n, 2), 8)))
    n_pad = _round_up(n, tb)
    if n_pad // tb < 2:
        n_pad = 2 * tb
    return tb, n_pad


# --------------------------------------------------------------------------
# Fused forward wrapper
# --------------------------------------------------------------------------
def diagonal_relu_forward(x, w1_t, readout, outp_dim):
    n, inp_dim = x.shape
    inp_dim_w, hpad = w1_t.shape
    assert inp_dim == inp_dim_w
    reduce_path = (outp_dim == 1)
    kernel = _fused_kernel_reduce if reduce_path else _fused_kernel_matmul

    vmem_cap = _vmem_capacity_bytes()
    weight_bytes = (w1_t.size * w1_t.dtype.itemsize
                    + readout.size * readout.dtype.itemsize)

    tb_cap = _batch_tile_cap(inp_dim, hpad, outp_dim, weight_bytes, vmem_cap)
    tb, n_pad = _choose_tiles(n, tb_cap)
    grid = (n_pad // tb,)

    if n_pad != n:  # zero rows contribute exactly 0 and are sliced off below
        x = jnp.pad(x, ((0, n_pad - n), (0, 0)))

    # Advisory cost estimate.
    flops = 2 * n_pad * inp_dim * hpad + 2 * n_pad * hpad * outp_dim
    bytes_accessed = (n_pad * inp_dim * 4 + weight_bytes + n_pad * outp_dim * 4)

    # VMEM: actual need + ~25% headroom, never above 3/4 of physical VMEM.
    per_step = 2 * tb * inp_dim * 4 + 2 * tb * outp_dim * 4 + 2 * tb * hpad * 4
    vmem_need = 2 * weight_bytes + per_step
    vmem_limit = int(min(max(int(vmem_need * 1.25) + (4 << 20), 16 << 20),
                         vmem_cap * 3 // 4))

    def make_call(single_buffer):
        def resident(shape):
            # Grid-invariant operands: request a single VMEM buffer.
            if single_buffer:
                return pl.BlockSpec(shape, lambda i: (0,) * len(shape),
                                    pipeline_mode=pl.Buffered(1))
            return pl.BlockSpec(shape, lambda i: (0,) * len(shape))

        return pl.pallas_call(
            kernel,
            out_shape=jax.ShapeDtypeStruct((n_pad, outp_dim), jnp.float32),
            grid_spec=pltpu.PrefetchScalarGridSpec(
                num_scalar_prefetch=0,
                grid=grid,
                in_specs=[
                    pl.BlockSpec((tb, inp_dim), lambda i: (i, 0)),  # x tile
                    resident((inp_dim, hpad)),                      # W1^T
                    resident(readout.shape),                        # c / W2^T
                ],
                out_specs=pl.BlockSpec((tb, outp_dim), lambda i: (i, 0)),
            ),
            compiler_params=pltpu.CompilerParams(
                dimension_semantics=("parallel",),
                vmem_limit_bytes=vmem_limit,
            ),
            cost_estimate=pl.CostEstimate(
                flops=flops, transcendentals=0, bytes_accessed=bytes_accessed),
        )

    try:
        y = make_call(True)(x, w1_t, readout)
    except Exception:
        # Fallback for JAX versions where pipeline_mode=pl.Buffered(1) is not
        # accepted on the pallas_call pipeline (only costs 2x weight VMEM).
        y = make_call(False)(x, w1_t, readout)
    return y[:n]


# --------------------------------------------------------------------------
# Model: parameter construction matching the PyTorch module.
# --------------------------------------------------------------------------
class DiagonalReLUNetworkPallas:
    def __init__(self, inp_dim, hdim=1000, outp_dim=1, scaling=1.0, key=None):
        key = jax.random.PRNGKey(0) if key is None else key
        k_w, k_d1, k_d2 = jax.random.split(key, 3)

        # dense.weight: N(0,1) rows normalized to unit L2 norm.
        w = jax.random.normal(k_w, (hdim, inp_dim), dtype=jnp.float32)
        w = w / jnp.sqrt(jnp.sum(w ** 2, axis=1, keepdims=True))
        coef = (2.0 / hdim) ** 0.25
        d1 = jnp.sign(jax.random.uniform(k_d1, (hdim,)) - 0.5) * coef
        w2 = jnp.sign(jax.random.uniform(k_d2, (outp_dim, hdim)) - 0.5) * coef

        self.inp_dim, self.hdim, self.outp_dim = inp_dim, hdim, outp_dim
        self.scaling = float(scaling)
        self.w1_f32, self.d1_f32, self.w2_f32 = w, d1, w2   # f32 masters (ref)

        # Kernel parameters: pre-transposed, zero-padded to a lane-dense hidden
        # width (multiple of 128). Zero padding contributes exactly 0.
        hpad = max(128, _round_up(hdim, 128))
        self.hpad = hpad
        w1_t = jnp.zeros((inp_dim, hpad), jnp.float32).at[:, :hdim].set(w.T)
        self.w1_t = w1_t.astype(jnp.bfloat16)

        # Fold d1 and scaling into the readout in f32 (before any narrow cast).
        if outp_dim == 1:
            c = self.scaling * d1 * w2[0]                        # (hdim,) f32
            self.readout = (jnp.zeros((1, hpad), jnp.float32)
                            .at[0, :hdim].set(c))                # stays f32
        else:
            w2s = self.scaling * (d1[:, None] * w2.T)            # (hdim, outp) f32
            self.readout = (jnp.zeros((hpad, outp_dim), jnp.float32)
                            .at[:hdim, :].set(w2s)).astype(jnp.bfloat16)

    def __call__(self, x):
        return diagonal_relu_forward(x, self.w1_t, self.readout, self.outp_dim)


# --------------------------------------------------------------------------
# Pure-JAX reference (first matmul in bf16 like the MXU) for the check.
# --------------------------------------------------------------------------
def reference_forward(x, model):
    h = jnp.dot(x.astype(jnp.bfloat16), model.w1_f32.astype(jnp.bfloat16).T,
                preferred_element_type=jnp.float32)
    h = jnp.maximum(h, 0.0) * model.d1_f32[None, :]
    y = jnp.dot(h, model.w2_f32.T)
    return model.scaling * y


if __name__ == "__main__":
    key = jax.random.PRNGKey(0)
    k_x, k_params = jax.random.split(key)

    batch, inp_dim, hdim, outp_dim = 8, 32, 128, 1
    x = jax.random.normal(k_x, (batch, inp_dim), dtype=jnp.float32)

    model = DiagonalReLUNetworkPallas(inp_dim, hdim=hdim, outp_dim=outp_dim,
                                      scaling=1.0, key=k_params)

    out = jax.block_until_ready(model(x))
    ref = reference_forward(x, model)

    assert out.shape == (batch, outp_dim)
    assert jnp.allclose(out, ref, atol=1e-3, rtol=1e-3), "mismatch vs reference"

    print("KERNEL_OK")
</pallas_src>

<mosaic_0001>
module attributes {stable_mosaic.version = 11 : i64} {
  func.func @_fused_kernel_reduce(%arg0: i32, %arg1: memref<8x32xf32, #tpu.memory_space<vmem>>, %arg2: memref<32x128xbf16, #tpu.memory_space<vmem>>, %arg3: memref<1x128xf32, #tpu.memory_space<vmem>>, %arg4: memref<8x1xf32, #tpu.memory_space<vmem>>) attributes {dimension_semantics = [#tpu.dimension_semantics<parallel>], iteration_bounds = array<i64: 2>, scalar_prefetch = 0 : i64, scratch_operands = 0 : i64, tpu.core_type = #tpu.core_type<tc>, window_params = [{transform_indices = @transform_0, window_bounds = array<i64: 8, 32>}, {pipeline_mode = #tpu.pipeline_mode<synchronous>, transform_indices = @transform_1, window_bounds = array<i64: 32, 128>}, {pipeline_mode = #tpu.pipeline_mode<synchronous>, transform_indices = @transform_2, window_bounds = array<i64: 1, 128>}, {transform_indices = @transform_3, window_bounds = array<i64: 8, 1>}]} {
    %c0 = arith.constant 0 : index
    %c0_0 = arith.constant 0 : index
    %0 = vector.load %arg1[%c0, %c0_0] : memref<8x32xf32, #tpu.memory_space<vmem>>, vector<8x32xf32>
    %1 = arith.truncf %0 : vector<8x32xf32> to vector<8x32xbf16>
    %c0_1 = arith.constant 0 : index
    %c0_2 = arith.constant 0 : index
    %2 = vector.load %arg2[%c0_1, %c0_2] : memref<32x128xbf16, #tpu.memory_space<vmem>>, vector<32x128xbf16>
    %cst = arith.constant dense<0.000000e+00> : vector<8x128xf32>
    %3 = tpu.matmul %1, %2, %cst {dimension_numbers = #tpu.dot_dimension_numbers<[1], [0], [0], [1], [0, 0, 1, 1], [], []>} : vector<8x32xbf16>, vector<32x128xbf16>, vector<8x128xf32> -> vector<8x128xf32>
    %cst_3 = arith.constant 0.000000e+00 : f32
    %4 = vector.broadcast %cst_3 : f32 to vector<8x128xf32>
    %5 = arith.maximumf %3, %4 : vector<8x128xf32>
    %c0_4 = arith.constant 0 : index
    %c0_5 = arith.constant 0 : index
    %6 = vector.load %arg3[%c0_4, %c0_5] : memref<1x128xf32, #tpu.memory_space<vmem>>, vector<1x128xf32>
    %7 = vector.broadcast %6 : vector<1x128xf32> to vector<8x128xf32>
    %8 = arith.mulf %5, %7 : vector<8x128xf32>
    %cst_6 = arith.constant dense<0.000000e+00> : vector<8xf32>
    %9 = vector.multi_reduction <add>, %8, %cst_6 [1] : vector<8x128xf32> to vector<8xf32>
    %10 = vector.shape_cast %9 : vector<8xf32> to vector<8x1xf32>
    %c0_7 = arith.constant 0 : index
    %c0_8 = arith.constant 0 : index
    %11 = vector.load %arg4[%c0_7, %c0_8] : memref<8x1xf32, #tpu.memory_space<vmem>>, vector<8x1xf32>
    tpu.vector_store %arg4[%c0_7, %c0_8], %10 {strides = array<i32>} : memref<8x1xf32, #tpu.memory_space<vmem>>, vector<8x1xf32>,
    return
  }
  func.func @transform_0(%arg0: i32) -> (i32, i32) {
    %c0_i32 = arith.constant 0 : i32
    %c0_i32_0 = arith.constant 0 : i32
    return %arg0, %c0_i32 : i32, i32
  }
  func.func @transform_1(%arg0: i32) -> (i32, i32) {
    %c0_i32 = arith.constant 0 : i32
    %c0_i32_0 = arith.constant 0 : i32
    %c0_i32_1 = arith.constant 0 : i32
    return %c0_i32, %c0_i32_0 : i32, i32
  }
  func.func @transform_2(%arg0: i32) -> (i32, i32) {
    %c0_i32 = arith.constant 0 : i32
    %c0_i32_0 = arith.constant 0 : i32
    %c0_i32_1 = arith.constant 0 : i32
    return %c0_i32, %c0_i32_0 : i32, i32
  }
  func.func @transform_3(%arg0: i32) -> (i32, i32) {
    %c0_i32 = arith.constant 0 : i32
    %c0_i32_0 = arith.constant 0 : i32
    return %arg0, %c0_i32 : i32, i32
  }
}

module attributes {stable_mosaic.version = 11 : i64} {
  func.func @_fused_kernel_reduce(%arg0: i32, %arg1: memref<8x32xf32, #tpu.memory_space<vmem>>, %arg2: memref<32x128xbf16, #tpu.memory_space<vmem>>, %arg3: memref<1x128xf32, #tpu.memory_space<vmem>>, %arg4: memref<8x1xf32, #tpu.memory_space<vmem>>) attributes {dimension_semantics = [#tpu.dimension_semantics<parallel>], iteration_bounds = array<i64: 2>, scalar_prefetch = 0 : i64, scratch_operands = 0 : i64, tpu.core_type = #tpu.core_type<tc>, window_params = [{transform_indices = @transform_0, window_bounds = array<i64: 8, 32>}, {pipeline_mode = #tpu.pipeline_mode<synchronous>, transform_indices = @transform_1, window_bounds = array<i64: 32, 128>}, {pipeline_mode = #tpu.pipeline_mode<synchronous>, transform_indices = @transform_2, window_bounds = array<i64: 1, 128>}, {transform_indices = @transform_3, window_bounds = array<i64: 8, 1>}]} {
    %c0 = arith.constant 0 : index
    %c0_0 = arith.constant 0 : index
    %0 = vector.load %arg1[%c0, %c0_0] : memref<8x32xf32, #tpu.memory_space<vmem>>, vector<8x32xf32>
    %1 = arith.truncf %0 : vector<8x32xf32> to vector<8x32xbf16>
    %c0_1 = arith.constant 0 : index
    %c0_2 = arith.constant 0 : index
    %2 = vector.load %arg2[%c0_1, %c0_2] : memref<32x128xbf16, #tpu.memory_space<vmem>>, vector<32x128xbf16>
    %cst = arith.constant dense<0.000000e+00> : vector<8x128xf32>
    %3 = tpu.matmul %1, %2, %cst {dimension_numbers = #tpu.dot_dimension_numbers<[1], [0], [0], [1], [0, 0, 1, 1], [], []>} : vector<8x32xbf16>, vector<32x128xbf16>, vector<8x128xf32> -> vector<8x128xf32>
    %cst_3 = arith.constant 0.000000e+00 : f32
    %4 = vector.broadcast %cst_3 : f32 to vector<8x128xf32>
    %5 = arith.maximumf %3, %4 : vector<8x128xf32>
    %c0_4 = arith.constant 0 : index
    %c0_5 = arith.constant 0 : index
    %6 = vector.load %arg3[%c0_4, %c0_5] : memref<1x128xf32, #tpu.memory_space<vmem>>, vector<1x128xf32>
    %7 = vector.broadcast %6 : vector<1x128xf32> to vector<8x128xf32>
    %8 = arith.mulf %5, %7 : vector<8x128xf32>
    %cst_6 = arith.constant dense<0.000000e+00> : vector<8xf32>
    %9 = vector.multi_reduction <add>, %8, %cst_6 [1] : vector<8x128xf32> to vector<8xf32>
    %10 = vector.shape_cast %9 : vector<8xf32> to vector<8x1xf32>
    %c0_7 = arith.constant 0 : index
    %c0_8 = arith.constant 0 : index
    %11 = vector.load %arg4[%c0_7, %c0_8] : memref<8x1xf32, #tpu.memory_space<vmem>>, vector<8x1xf32>
    tpu.vector_store %arg4[%c0_7, %c0_8], %10 {strides = array<i32>} : memref<8x1xf32, #tpu.memory_space<vmem>>, vector<8x1xf32>,
    return
  }
  func.func @transform_0(%arg0: i32) -> (i32, i32) {
    %c0_i32 = arith.constant 0 : i32
    %c0_i32_0 = arith.constant 0 : i32
    return %arg0, %c0_i32 : i32, i32
  }
  func.func @transform_1(%arg0: i32) -> (i32, i32) {
    %c0_i32 = arith.constant 0 : i32
    %c0_i32_0 = arith.constant 0 : i32
    %c0_i32_1 = arith.constant 0 : i32
    return %c0_i32, %c0_i32_0 : i32, i32
  }
  func.func @transform_2(%arg0: i32) -> (i32, i32) {
    %c0_i32 = arith.constant 0 : i32
    %c0_i32_0 = arith.constant 0 : i32
    %c0_i32_1 = arith.constant 0 : i32
    return %c0_i32, %c0_i32_0 : i32, i32
  }
  func.func @transform_3(%arg0: i32) -> (i32, i32) {
    %c0_i32 = arith.constant 0 : i32
    %c0_i32_0 = arith.constant 0 : i32
    return %arg0, %c0_i32 : i32, i32
  }
}

</mosaic_0001>

<bundles_post_ra>
// kernel: tpu_custom_call.1
= control target key start
LH: loop header
LB: loop body
LE: loop exit
PB: predicated region body
PF: predicated region fallthrough
CT: control target
= control target key end

     0   :  { %8 = vsyncpa [#allocation3], 0  ;;  %s675_s0 = inlined_call_operand.hbm [shape: f32[16,32], index: 0, kind: input, shape index: {}]   ;;  %s676_s1 = inlined_call_operand.hbm [shape: bf16[32,128], index: 1, kind: input, shape index: {}]   ;;  %s677_s2 = inlined_call_operand.vmem [shape: f32[1,128], index: 2, kind: input, shape index: {}]   ;;  %s678_s3 = inlined_call_operand.vmem [shape: f32[16,1], index: 3, kind: output, shape index: {}]  }
   0x1   :  { %10 = vsyncpa [#allocation3 + $0x1], 0 }
   0x2   :  { %11 = vsyncpa [#allocation5], 0  ;;  %s555_s12 = smov 0   ;;  %s557_s13 = smov 0  }
   0x3   :  { %s559_s14 = smov 0   ;;  %s561_s15 = smov 0  }
   0x4 LB: > { %s574_s16 = sadd.s32 4294967295, %s527_s15   ;;  %p37_p0 = scmp.ne.s32.totalorder %s519_s13, %s515_s12  ;;  %s527_s15 = sphi %s561_s15, %s693_s15   ;;  %s523_s14 = sphi %s559_s14, %s692_s14   ;;  %s519_s13 = sphi %s557_s13, %s691_s13   ;;  %s515_s12 = sphi %s555_s12, %s690_s12  }
   0x5   : > { %p679_p1 = scmp.eq.s32.totalorder %s574_s16, 0  ;;  %p353_p2 = scmp.ge.s32.totalorder %s527_s15, 1 }
   0x6   : > { %p116_p3 = scmp.lt.s32.totalorder %s527_s15, 3  ;;  %s529_s19 = smov [#allocation4]  }
   0x7   : > { %p582_p4 = por %p679_p1, %p37_p0  ;;  %s128_s20 = sshll.u32 %s529_s19, 4  ;;  %s129_s20 = int_to_ptr.vmem [resolvable:$true] %s128_s20 }
   0x8   : > { %p586_p5 = pnand %p353_p2, %p116_p3  ;;  %s599_s22 = sadd.s32 1, %s527_s15  }
   0x9   : > { %s682_s17 = scalar_select %p582_p4, 1, 0 }
   0xa   : > { %s683_s18 = scalar_select %p586_p5, 1, 0 }
   0xb   : > { %p385_p6 = pneg %p586_p5  ;;  %s24_s23 = sadd.s32 1, %s523_s14 }
   0xc   : > { %s21_s24 = ssub.s32 %s527_s15, %s599_s22  ;;  %s446_s25 = scalar_lea.vmem %s129_s20, 256 }
   0xd   : > { %p594_p7 = pnand %p385_p6, %p679_p1  ;;  %p447_p9 = scmp.ne.s32.totalorder %s129_s20, %s446_s25 }
   0xe   : > { %p454_p12 = scmp.lt.s32.totalorder %s129_s20, %s129_s20  ;;  %p455_p13 = scmp.lt.s32.totalorder %s446_s25, %s446_s25 }
   0xf   : > { %p437_p8 = pneg %p594_p7 }
  0x10   : > { %p456_p0 = por %p455_p13, %p454_p12 }
  0x11   : > { %p449_p10 = pnand %p447_p9, %p437_p8 }
  0x13   : > { %p450_p11 = pneg %p449_p10 }
  0x15   : > { %p457_p2 = pnand %p456_p0, %p450_p11 }
  0x17   : > { %460 = shalt.err (!%p457_p2)
}
  0x18   : > { %s530_s26 = smov 64   ;;  %s531_s27 = smov 4  }
  0x19   : > { %388 = dma.hbm_to_vmem [thread:$0]  (!%p594_p7), %s676_s1, 256, %s129_s20, [#allocation5], %s530_s26, %s530_s26, %s531_s27  }
  0x1a   : > { %p22_p3 = scmp.eq.s32.totalorder %s21_s24, 0  ;;  %p31_p6 = scmp.ne.s32.totalorder %s523_s14, %s519_s13 }
  0x1b   : > { %p32_p8 = scmp.eq.s32.totalorder %s527_s15, 0  ;;  %p394_p9 = scmp.lt.s32.totalorder %s527_s15, 2 }
  0x1c   : > { %s616_s30 = scalar_select %p22_p3, %s523_s14, %s24_s23  }
  0x1d   : > { %p33_p10 = por %p32_p8, %p31_p6  ;;  %s145_s4 = sand.u32 1, %s523_s14  }
  0x1e   : > { %s356_s5 = sshll.u32 %s145_s4, 3  ;;  %s357_s6 = sshll.u32 %s527_s15, 7 }
  0x1f   : > { %s623_s9 = scalar_lea.hbm %s675_s0, %s357_s6  ;;  %s149_s10 = scalar_lea.vmem [#allocation2], %s356_s5 }
  0x20   : > { %s156_s11 = sshll.u32 %s149_s10, 4  ;;  %p625_p7 = pnand %p394_p9, %p33_p10  ;;  %s157_s11 = int_to_ptr.vmem [resolvable:$true] %s156_s11 }
  0x21   : > { %s146_s19 = scalar_lea.sflag [#allocation3], %s145_s4  ;;  %s461_s20 = scalar_lea.hbm %s623_s9, 128 }
  0x22   : > { %p462_p11 = scmp.ne.s32.totalorder %s623_s9, %s461_s20  ;;  %p463_p12 = pneg %p625_p7 }
  0x23   : > { %s466_s23 = scalar_lea.hbm %s675_s0, 256  ;;  %p467_p2 = scmp.lt.s32.totalorder %s623_s9, %s675_s0 }
  0x24   : > { %p464_p13 = pnand %p463_p12, %p462_p11  ;;  %p468_p3 = scmp.lt.s32.totalorder %s466_s23, %s461_s20 }
  0x26   : > { %p465_p0 = pneg %p464_p13  ;;  %p469_p6 = por %p468_p3, %p467_p2 }
  0x28   : > { %p470_p8 = pnand %p469_p6, %p465_p0 }
  0x2a   : > { %473 = shalt.err (!%p470_p8)
}
  0x2b   : > { %s474_s26 = scalar_lea.vmem %s157_s11, 128  ;;  %s532_s27 = smov [#allocation2]  }
  0x2c   : > { %p475_p9 = scmp.ne.s32.totalorder %s157_s11, %s474_s26  ;;  %s479_s28 = sshll.u32 %s532_s27, 4  ;;  %s480_s28 = int_to_ptr.vmem [resolvable:$false] %s479_s28 }
  0x2d   : > { %s481_s29 = scalar_lea.vmem %s480_s28, 256  ;;  %p482_p11 = scmp.lt.s32.totalorder %s157_s11, %s480_s28 }
  0x2e   : > { %p477_p10 = pnand %p475_p9, %p463_p12  ;;  %p483_p13 = scmp.lt.s32.totalorder %s481_s29, %s474_s26 }
  0x30   : > { %p478_p1 = pneg %p477_p10  ;;  %p484_p4 = por %p483_p13, %p482_p11 }
  0x32   : > { %p485_p5 = pnand %p484_p4, %p478_p1 }
  0x34   : > { %488 = shalt.err (!%p485_p5)
}
  0x35   : > { %392 = dma.hbm_to_vmem [thread:$0]  (!%p625_p7), %s623_s9, 128, %s157_s11, %s146_s19  }
  0x36   : > { %p686_p0 = scmp.ne.s32.totalorder %s683_s18, 0 }
  0x37   : > { %s167_s4 = sand.u32 (!%p686_p0), 1, %s519_s13   ;;  %p687_p12 = scmp.ne.s32.totalorder (!%p686_p0), %s682_s17, 0 }
  0x38   : > { %165 = sbr.rel (%p686_p0) target bundleno = 410 (0x19a), region = 32  ;;  %s359_s5 = sshll.u32 (!%p686_p0), %s167_s4, 3 }
  0x39   : > { %s168_s6 = scalar_lea.sflag (!%p686_p0), [#allocation3], %s167_s4  ;;  %s171_s7 = scalar_lea.vmem (!%p686_p0), [#allocation2], %s359_s5 }
  0x3d   : > { %506 = dma.done.wait (%p687_p12), %s168_s6, 128  }
  0x3e   : > { %508 = vsyncadd (%p687_p12), %s168_s6, 4294967168  ;;  %p688_p1 = scmp.eq.s32.totalorder %s574_s16, 0 }
  0x40   : > { %510 = dma.done.wait (%p688_p1), [#allocation5], 256   ;;  %p689_p4 = pmov %p688_p1 }
  0x41   : > { %v533_v0 = vmov 0.0   ;;  %vm534_vm0 = vmmov 0   ;;  %v433_v1 = vld [vmem:[#allocation4 + $0x8] sm:$0xff]   ;;  %v434_v2 = vld [vmem:[#allocation4] sm:$0xff]   ;;  %v202_v3 = vld [vmem:[%s171_s7] sm:$0xff]  ;;  %vm220_vm1 = vcmask 261120  }
  0x42   : > { %512 = vsyncadd (%p689_p4), [#allocation5], 4294967040  ;;  %371 = vmatprep.subr.bf16.mxu0 %v533_v0  ;;  %375 = vmatprep.mubr.msk.bf16.mxu0 %vm534_vm0, %v533_v0  ;;  %v203_v4 = vpack.c.bf16 %v202_v3, %v202_v3  ;;  %v365_v6 = vld [vmem:[%s677_s2] ss:$0 sm:$0xff]  ;;  %p197_p5 = scmp.lt.s32.totalorder %s574_s16, 1  ;;  %vm275_vm2 = vcmask 7168  }
  0x43   : > { %372 = vmatpush3.bf16.msra.mxu0 %v433_v1 }
  0x44   : > { %373 = vmatprep.subr.bf16.mxu0 %v533_v0  ;;  %s695_s16 = smov (!%p197_p5, %s574_s16), 1 }
  0x45   : > { %s361_s8 = sshll.u32 %s695_s16, 3 }
  0x46   : > { %s200_s11 = scalar_lea.vmem %s678_s3, %s361_s8 }
  0x47   : > { %374 = vmatpush3.bf16.msra.mxu0 %v434_v2 }
  0x4a   : > { %376 = vmatmul.mubr.msk.bf16.vlgmr.msra.gmra.mxu0 %vm220_vm1, %v203_v4 }
 0x10a   : > { %v258_v5 = vpop.f32.mrf.mxu0 }
 0x10b   : > { %v264_v7 = vmax.f32 %v258_v5, 0.0 }
 0x10c   : > { %v377_v8 = vpop.f32.mrf.mxu0 }
 0x10d   : > { %v272_v9 = vmul.f32 %v365_v6, %v264_v7 }
 0x10e   : > { %v261_v10 = vpop.f32.mrf.mxu0 }
 0x10f   : > { %273 = vadd.xlane.f32.xlu0 %v272_v9 }
 0x110   : > { %v378_v11 = vpop.f32.mrf.mxu0 }
 0x198   : > { %v274_v12 = vpop.xlane.xlu0 %273 }
 0x199   : > { %276 = vst.msk [vmem:[%s200_s11] sm:$0xff] %vm275_vm2, %v274_v12 }
 0x19a PF: > { %p14_p7 = scmp.ge.s32.totalorder %s599_s22, 4   ;;  %s690_s12 = smov %s519_s13 }
 0x19b   : > { %s691_s13 = smov %s523_s14  ;;  %s692_s14 = smov %s616_s30 }
 0x19c   : > { %s693_s15 = smov %s599_s22  ;;  %16 = sbr.rel (!%p14_p7) target bundleno = 4 (0x4), region = 76 }
 0x1a1   :  { %296 = vsyncpa [#allocation3], 1 }
 0x1a2   :  { %298 = vsyncpa [#allocation3 + $0x1], 1 }
 0x1a3   :  { %299 = vsyncpa [#allocation5], 1 }

// kernel: tpu_custom_call.1
= control target key start
LH: loop header
LB: loop body
LE: loop exit
PB: predicated region body
PF: predicated region fallthrough
CT: control target
= control target key end

     0   :  { %8 = vsyncpa [#allocation3], 0  ;;  %s675_s0 = inlined_call_operand.hbm [shape: f32[16,32], index: 0, kind: input, shape index: {}]   ;;  %s676_s1 = inlined_call_operand.hbm [shape: bf16[32,128], index: 1, kind: input, shape index: {}]   ;;  %s677_s2 = inlined_call_operand.vmem [shape: f32[1,128], index: 2, kind: input, shape index: {}]   ;;  %s678_s3 = inlined_call_operand.vmem [shape: f32[16,1], index: 3, kind: output, shape index: {}]  }
   0x1   :  { %10 = vsyncpa [#allocation3 + $0x1], 0 }
   0x2   :  { %11 = vsyncpa [#allocation5], 0  ;;  %s555_s12 = smov 0   ;;  %s557_s13 = smov 0  }
   0x3   :  { %s559_s14 = smov 0   ;;  %s561_s15 = smov 0  }
   0x4 LB: > { %s574_s16 = sadd.s32 4294967295, %s527_s15   ;;  %p37_p0 = scmp.ne.s32.totalorder %s519_s13, %s515_s12  ;;  %s527_s15 = sphi %s561_s15, %s693_s15   ;;  %s523_s14 = sphi %s559_s14, %s692_s14   ;;  %s519_s13 = sphi %s557_s13, %s691_s13   ;;  %s515_s12 = sphi %s555_s12, %s690_s12  }
   0x5   : > { %p679_p1 = scmp.eq.s32.totalorder %s574_s16, 0  ;;  %p353_p2 = scmp.ge.s32.totalorder %s527_s15, 1 }
   0x6   : > { %p116_p3 = scmp.lt.s32.totalorder %s527_s15, 3  ;;  %s529_s19 = smov [#allocation4]  }
   0x7   : > { %p582_p4 = por %p679_p1, %p37_p0  ;;  %s128_s20 = sshll.u32 %s529_s19, 4  ;;  %s129_s20 = int_to_ptr.vmem [resolvable:$true] %s128_s20 }
   0x8   : > { %p586_p5 = pnand %p353_p2, %p116_p3  ;;  %s599_s22 = sadd.s32 1, %s527_s15  }
   0x9   : > { %s682_s17 = scalar_select %p582_p4, 1, 0 }
   0xa   : > { %s683_s18 = scalar_select %p586_p5, 1, 0 }
   0xb   : > { %p385_p6 = pneg %p586_p5  ;;  %s24_s23 = sadd.s32 1, %s523_s14 }
   0xc   : > { %s21_s24 = ssub.s32 %s527_s15, %s599_s22  ;;  %s446_s25 = scalar_lea.vmem %s129_s20, 256 }
   0xd   : > { %p594_p7 = pnand %p385_p6, %p679_p1  ;;  %p447_p9 = scmp.ne.s32.totalorder %s129_s20, %s446_s25 }
   0xe   : > { %p454_p12 = scmp.lt.s32.totalorder %s129_s20, %s129_s20  ;;  %p455_p13 = scmp.lt.s32.totalorder %s446_s25, %s446_s25 }
   0xf   : > { %p437_p8 = pneg %p594_p7 }
  0x10   : > { %p456_p0 = por %p455_p13, %p454_p12 }
  0x11   : > { %p449_p10 = pnand %p447_p9, %p437_p8 }
  0x13   : > { %p450_p11 = pneg %p449_p10 }
  0x15   : > { %p457_p2 = pnand %p456_p0, %p450_p11 }
  0x17   : > { %460 = shalt.err (!%p457_p2)
}
  0x18   : > { %s530_s26 = smov 64   ;;  %s531_s27 = smov 4  }
  0x19   : > { %388 = dma.hbm_to_vmem [thread:$0]  (!%p594_p7), %s676_s1, 256, %s129_s20, [#allocation5], %s530_s26, %s530_s26, %s531_s27  }
  0x1a   : > { %p22_p3 = scmp.eq.s32.totalorder %s21_s24, 0  ;;  %p31_p6 = scmp.ne.s32.totalorder %s523_s14, %s519_s13 }
  0x1b   : > { %p32_p8 = scmp.eq.s32.totalorder %s527_s15, 0  ;;  %p394_p9 = scmp.lt.s32.totalorder %s527_s15, 2 }
  0x1c   : > { %s616_s30 = scalar_select %p22_p3, %s523_s14, %s24_s23  }
  0x1d   : > { %p33_p10 = por %p32_p8, %p31_p6  ;;  %s145_s4 = sand.u32 1, %s523_s14  }
  0x1e   : > { %s356_s5 = sshll.u32 %s145_s4, 3  ;;  %s357_s6 = sshll.u32 %s527_s15, 7 }
  0x1f   : > { %s623_s9 = scalar_lea.hbm %s675_s0, %s357_s6  ;;  %s149_s10 = scalar_lea.vmem [#allocation2], %s356_s5 }
  0x20   : > { %s156_s11 = sshll.u32 %s149_s10, 4  ;;  %p625_p7 = pnand %p394_p9, %p33_p10  ;;  %s157_s11 = int_to_ptr.vmem [resolvable:$true] %s156_s11 }
  0x21   : > { %s146_s19 = scalar_lea.sflag [#allocation3], %s145_s4  ;;  %s461_s20 = scalar_lea.hbm %s623_s9, 128 }
  0x22   : > { %p462_p11 = scmp.ne.s32.totalorder %s623_s9, %s461_s20  ;;  %p463_p12 = pneg %p625_p7 }
  0x23   : > { %s466_s23 = scalar_lea.hbm %s675_s0, 256  ;;  %p467_p2 = scmp.lt.s32.totalorder %s623_s9, %s675_s0 }
  0x24   : > { %p464_p13 = pnand %p463_p12, %p462_p11  ;;  %p468_p3 = scmp.lt.s32.totalorder %s466_s23, %s461_s20 }
  0x26   : > { %p465_p0 = pneg %p464_p13  ;;  %p469_p6 = por %p468_p3, %p467_p2 }
  0x28   : > { %p470_p8 = pnand %p469_p6, %p465_p0 }
  0x2a   : > { %473 = shalt.err (!%p470_p8)
}
  0x2b   : > { %s474_s26 = scalar_lea.vmem %s157_s11, 128  ;;  %s532_s27 = smov [#allocation2]  }
  0x2c   : > { %p475_p9 = scmp.ne.s32.totalorder %s157_s11, %s474_s26  ;;  %s479_s28 = sshll.u32 %s532_s27, 4  ;;  %s480_s28 = int_to_ptr.vmem [resolvable:$false] %s479_s28 }
  0x2d   : > { %s481_s29 = scalar_lea.vmem %s480_s28, 256  ;;  %p482_p11 = scmp.lt.s32.totalorder %s157_s11, %s480_s28 }
  0x2e   : > { %p477_p10 = pnand %p475_p9, %p463_p12  ;;  %p483_p13 = scmp.lt.s32.totalorder %s481_s29, %s474_s26 }
  0x30   : > { %p478_p1 = pneg %p477_p10  ;;  %p484_p4 = por %p483_p13, %p482_p11 }
  0x32   : > { %p485_p5 = pnand %p484_p4, %p478_p1 }
  0x34   : > { %488 = shalt.err (!%p485_p5)
}
  0x35   : > { %392 = dma.hbm_to_vmem [thread:$0]  (!%p625_p7), %s623_s9, 128, %s157_s11, %s146_s19  }
  0x36   : > { %p686_p0 = scmp.ne.s32.totalorder %s683_s18, 0 }
  0x37   : > { %s167_s4 = sand.u32 (!%p686_p0), 1, %s519_s13   ;;  %p687_p12 = scmp.ne.s32.totalorder (!%p686_p0), %s682_s17, 0 }
  0x38   : > { %165 = sbr.rel (%p686_p0) target bundleno = 410 (0x19a), region = 32  ;;  %s359_s5 = sshll.u32 (!%p686_p0), %s167_s4, 3 }
  0x39   : > { %s168_s6 = scalar_lea.sflag (!%p686_p0), [#allocation3], %s167_s4  ;;  %s171_s7 = scalar_lea.vmem (!%p686_p0), [#allocation2], %s359_s5 }
  0x3d   : > { %506 = dma.done.wait (%p687_p12), %s168_s6, 128  }
  0x3e   : > { %508 = vsyncadd (%p687_p12), %s168_s6, 4294967168  ;;  %p688_p1 = scmp.eq.s32.totalorder %s574_s16, 0 }
  0x40   : > { %510 = dma.done.wait (%p688_p1), [#allocation5], 256   ;;  %p689_p4 = pmov %p688_p1 }
  0x41   : > { %v533_v0 = vmov 0.0   ;;  %vm534_vm0 = vmmov 0   ;;  %v433_v1 = vld [vmem:[#allocation4 + $0x8] sm:$0xff]   ;;  %v434_v2 = vld [vmem:[#allocation4] sm:$0xff]   ;;  %v202_v3 = vld [vmem:[%s171_s7] sm:$0xff]  ;;  %vm220_vm1 = vcmask 261120  }
  0x42   : > { %512 = vsyncadd (%p689_p4), [#allocation5], 4294967040  ;;  %371 = vmatprep.subr.bf16.mxu0 %v533_v0  ;;  %375 = vmatprep.mubr.msk.bf16.mxu0 %vm534_vm0, %v533_v0  ;;  %v203_v4 = vpack.c.bf16 %v202_v3, %v202_v3  ;;  %v365_v6 = vld [vmem:[%s677_s2] ss:$0 sm:$0xff]  ;;  %p197_p5 = scmp.lt.s32.totalorder %s574_s16, 1  ;;  %vm275_vm2 = vcmask 7168  }
  0x43   : > { %372 = vmatpush3.bf16.msra.mxu0 %v433_v1 }
  0x44   : > { %373 = vmatprep.subr.bf16.mxu0 %v533_v0  ;;  %s695_s16 = smov (!%p197_p5, %s574_s16), 1 }
  0x45   : > { %s361_s8 = sshll.u32 %s695_s16, 3 }
  0x46   : > { %s200_s11 = scalar_lea.vmem %s678_s3, %s361_s8 }
  0x47   : > { %374 = vmatpush3.bf16.msra.mxu0 %v434_v2 }
  0x4a   : > { %376 = vmatmul.mubr.msk.bf16.vlgmr.msra.gmra.mxu0 %vm220_vm1, %v203_v4 }
 0x10a   : > { %v258_v5 = vpop.f32.mrf.mxu0 }
 0x10b   : > { %v264_v7 = vmax.f32 %v258_v5, 0.0 }
 0x10c   : > { %v377_v8 = vpop.f32.mrf.mxu0 }
 0x10d   : > { %v272_v9 = vmul.f32 %v365_v6, %v264_v7 }
 0x10e   : > { %v261_v10 = vpop.f32.mrf.mxu0 }
 0x10f   : > { %273 = vadd.xlane.f32.xlu0 %v272_v9 }
 0x110   : > { %v378_v11 = vpop.f32.mrf.mxu0 }
 0x198   : > { %v274_v12 = vpop.xlane.xlu0 %273 }
 0x199   : > { %276 = vst.msk [vmem:[%s200_s11] sm:$0xff] %vm275_vm2, %v274_v12 }
 0x19a PF: > { %p14_p7 = scmp.ge.s32.totalorder %s599_s22, 4   ;;  %s690_s12 = smov %s519_s13 }
 0x19b   : > { %s691_s13 = smov %s523_s14  ;;  %s692_s14 = smov %s616_s30 }
 0x19c   : > { %s693_s15 = smov %s599_s22  ;;  %16 = sbr.rel (!%p14_p7) target bundleno = 4 (0x4), region = 76 }
 0x1a1   :  { %296 = vsyncpa [#allocation3], 1 }
 0x1a2   :  { %298 = vsyncpa [#allocation3 + $0x1], 1 }
 0x1a3   :  { %299 = vsyncpa [#allocation5], 1 }

</bundles_post_ra>
